<compile_context>
chip_gen: v6e
topology: v6e:2x2x1
jax: 0.10.0
libtpu: 0.0.40
codegen_flags: <defaults>
</compile_context>

<pallas_src>
import functools

import jax
import jax.numpy as jnp
from jax.experimental import pallas as pl
from jax.experimental.pallas import tpu as pltpu

_LANES = 128
_ROW_ALIGN = 32           # int8 native sublane tile is (32, 128); covers f32/bf16 too
_MAX_UNROLLED_TYPES = 32  # beyond this the select chain flips the kernel VPU-bound


def _round_up(x, m):
    return ((x + m - 1) // m) * m


def _pss_kernel(species_ref, field_ref, scales_ref, shifts_ref, out_ref, *, num_types):
    """One (tile_rows, 128) lane-dense tile.

    Per-species "gather" is an unrolled compare/select chain on the VPU (num_types
    is a handful of chemical elements), fused with the scale*x + shift FMA in f32.
    Out-of-range species (incl. the padding sentinel of the fallback path and any
    garbage rows of a ragged final block) fall through with scale = shift = 0.
    """
    sp = species_ref[...].astype(jnp.int32)      # int8 HBM stream, widened once in-vreg
    x = field_ref[...].astype(jnp.float32)
    scale = jnp.zeros(sp.shape, jnp.float32)
    shift = jnp.zeros(sp.shape, jnp.float32)
    for t in range(num_types):                   # 1 compare + 2 selects per type
        m = sp == t
        scale = jnp.where(m, scales_ref[t], scale)
        shift = jnp.where(m, shifts_ref[t], shift)
    out_ref[...] = (scale * x + shift).astype(out_ref.dtype)


def per_species_scale_shift(species_idx, in_field, scales=None, shifts=None, *,
                            max_tile_rows=2048, input_buffer_count=2):
    """JAX wrapper for PerSpeciesScaleShift.forward on the '0e' field.

    species_idx: (N,) int; in_field: (N, D) float; scales/shifts: (num_types,)
    (either may be None -> identity, mirroring has_scales/has_shifts).
    Returns (N, D) in in_field's dtype.

    Fast path (no extra HBM copies) requires N*D % 128 == 0; otherwise a single
    pad + slice fallback is used.  Out-of-range species map to scale=0/shift=0
    (PyTorch indexing would raise); inputs are assumed valid.
    """
    assert in_field.ndim == 2, "in_field must be (N_atoms, feat)"
    N, D = in_field.shape
    assert species_idx.shape == (N,), "species_idx must be (N_atoms,)"
    assert scales is not None or shifts is not None
    num_types = int((scales if scales is not None else shifts).shape[0])
    if num_types > _MAX_UNROLLED_TYPES:
        raise NotImplementedError(
            f"num_types={num_types} > {_MAX_UNROLLED_TYPES}: the unrolled compare/"
            "select chain would become VPU-bound; use a packed (scale,shift) table "
            "with a single select chain (or one-hot MXU gather) for large type counts.")
    if scales is None:
        scales = jnp.ones((num_types,), jnp.float32)
    if shifts is None:
        shifts = jnp.zeros((num_types,), jnp.float32)
    assert scales.shape == (num_types,) and shifts.shape == (num_types,)
    assert max_tile_rows >= _ROW_ALIGN and max_tile_rows % _ROW_ALIGN == 0

    dtype = in_field.dtype
    total = N * D
    if total == 0:
        return in_field

    # ---- Species stream: int8 (num_types <= 32 << 127). Only lane-broadcast over
    # D when D > 1 (for '0e' fields D == 1, so no broadcast materialization).
    species_i8 = species_idx.astype(jnp.int8)
    if D == 1:
        species_flat = species_i8                                   # (total,)
    else:
        # TODO(synk): for very large D, gathering per-atom scale/shift in XLA and
        # streaming those instead would avoid the D-fold int8 replication.
        species_flat = jnp.broadcast_to(species_i8[:, None], (N, D)).reshape(total)
    field_flat = in_field.reshape(total)

    # ---- Lane-dense (rows, 128) view.  When 128 | total this is a pure reshape
    # (same flat element order, no pad, no slice).  The ragged last ROW block of
    # the grid (rows % tile_rows != 0) is handled by Pallas's clipped DMAs.
    rows = pl.cdiv(total, _LANES)
    padded = (rows * _LANES) != total
    if padded:
        # Fallback: one pad in, one slice out.  Callers that care should pad the
        # atom batch to a multiple of 128 upstream (once), not per call.
        pad = rows * _LANES - total
        field_flat = jnp.pad(field_flat, (0, pad))
        species_flat = jnp.pad(species_flat, (0, pad), constant_values=num_types)
    field2d = field_flat.reshape(rows, _LANES)
    species2d = species_flat.reshape(rows, _LANES)

    # ---- Tile selection: biggest tile <= max_tile_rows, but always >= 2 grid
    # steps when rows > 32 so v7x's two TensorCores both get rows ("parallel").
    if rows <= _ROW_ALIGN:
        tile_rows = rows                       # single full-extent block (alignment-exempt)
    else:
        tile_rows = min(max_tile_rows, _round_up(pl.cdiv(rows, 2), _ROW_ALIGN))
    grid = pl.cdiv(rows, tile_rows)

    # Optional deeper pipelining for the streaming inputs (only useful if tiles
    # are shrunk well below the default; VMEM headroom is ample on all chips).
    stream_kwargs = {}
    if input_buffer_count > 2:
        stream_kwargs["pipeline_mode"] = pl.Buffered(input_buffer_count)

    itemsize = jnp.dtype(dtype).itemsize
    cost = pl.CostEstimate(
        flops=2 * total,
        transcendentals=0,
        bytes_accessed=int(rows * _LANES * (itemsize + 1 + itemsize) + 2 * num_types * 4),
    )

    out2d = pl.pallas_call(
        functools.partial(_pss_kernel, num_types=num_types),
        out_shape=jax.ShapeDtypeStruct((rows, _LANES), dtype),
        grid_spec=pltpu.PrefetchScalarGridSpec(
            num_scalar_prefetch=0,
            grid=(grid,),
            in_specs=[
                pl.BlockSpec((tile_rows, _LANES), lambda i: (i, 0), **stream_kwargs),  # species i8
                pl.BlockSpec((tile_rows, _LANES), lambda i: (i, 0), **stream_kwargs),  # field
                # (num_types,) tables live on the scalar path; read per type per tile.
                pl.BlockSpec(memory_space=pltpu.MemorySpace.SMEM),                      # scales f32
                pl.BlockSpec(memory_space=pltpu.MemorySpace.SMEM),                      # shifts f32
            ],
            out_specs=pl.BlockSpec((tile_rows, _LANES), lambda i: (i, 0)),
        ),
        compiler_params=pltpu.CompilerParams(
            dimension_semantics=("parallel",),   # rows shard across v7x's 2 TCs
        ),
        cost_estimate=cost,
    )(species2d, field2d, scales.astype(jnp.float32), shifts.astype(jnp.float32))

    if padded:
        return out2d.reshape(-1)[:total].reshape(N, D)
    return out2d.reshape(N, D)


if __name__ == "__main__":
    key = jax.random.PRNGKey(0)
    k1, k2, k3, k4, k5, k6, k7, k8 = jax.random.split(key, 8)

    num_types = 5  # e.g. H, C, N, O, S
    scales = 0.5 + jax.random.uniform(k1, (num_types,), dtype=jnp.float32)
    shifts = jax.random.normal(k2, (num_types,), dtype=jnp.float32)

    def reference(species, field):
        return (scales[species][:, None] * field.astype(jnp.float32)
                + shifts[species][:, None]).astype(field.dtype)

    # Case 1: '0e' field (D=1), N a multiple of 128 -> copy-free path.
    # rows=96 with tile_rows=64 -> grid=2 (both v7x TCs) and a ragged final block
    # (rows 64..95 valid, 96..127 out-of-bounds) -> verifies OOB writes are dropped.
    n1 = 96 * 128
    sp1 = jax.random.randint(k3, (n1,), 0, num_types, dtype=jnp.int32)
    f1 = jax.random.normal(k4, (n1, 1), dtype=jnp.float32)
    out1 = jax.block_until_ready(
        per_species_scale_shift(sp1, f1, scales, shifts, max_tile_rows=64))
    assert out1.shape == f1.shape and out1.dtype == f1.dtype
    assert jnp.allclose(out1, reference(sp1, f1), atol=1e-6, rtol=1e-6), "case 1 mismatch"

    # Case 2: N not a multiple of 128 -> padded fallback path, default tiling.
    n2 = 1000
    sp2 = jax.random.randint(k5, (n2,), 0, num_types, dtype=jnp.int32)
    f2 = jax.random.normal(k6, (n2, 1), dtype=jnp.float32)
    out2 = jax.block_until_ready(per_species_scale_shift(sp2, f2, scales, shifts))
    assert out2.shape == f2.shape
    assert jnp.allclose(out2, reference(sp2, f2), atol=1e-6, rtol=1e-6), "case 2 mismatch"

    # Case 3: multi-feature field (D=6, total=384=3*128) -> copy-free path with
    # the int8 species lane-broadcast.
    n3, d3 = 64, 6
    sp3 = jax.random.randint(k7, (n3,), 0, num_types, dtype=jnp.int32)
    f3 = jax.random.normal(k8, (n3, d3), dtype=jnp.float32)
    out3 = jax.block_until_ready(per_species_scale_shift(sp3, f3, scales, shifts))
    assert out3.shape == f3.shape
    assert jnp.allclose(out3, reference(sp3, f3), atol=1e-6, rtol=1e-6), "case 3 mismatch"

    # Case 4: bf16 field; params stay f32 inside the kernel, only the result is cast.
    f4 = f3.astype(jnp.bfloat16)
    out4 = jax.block_until_ready(per_species_scale_shift(sp3, f4, scales, shifts))
    assert out4.dtype == jnp.bfloat16 and out4.shape == f4.shape
    assert jnp.allclose(out4.astype(jnp.float32),
                        reference(sp3, f4).astype(jnp.float32),
                        atol=1e-2, rtol=1e-2), "case 4 mismatch"

    print("KERNEL_OK")
</pallas_src>

<mosaic_0001>
module attributes {stable_mosaic.version = 11 : i64} {
  func.func @_pss_kernel(%arg0: i32, %arg1: memref<64x128xi8, #tpu.memory_space<vmem>>, %arg2: memref<64x128xf32, #tpu.memory_space<vmem>>, %arg3: memref<5xf32, #tpu.memory_space<smem>>, %arg4: memref<5xf32, #tpu.memory_space<smem>>, %arg5: memref<64x128xf32, #tpu.memory_space<vmem>>) attributes {dimension_semantics = [#tpu.dimension_semantics<parallel>], iteration_bounds = array<i64: 2>, scalar_prefetch = 0 : i64, scratch_operands = 0 : i64, tpu.core_type = #tpu.core_type<tc>, window_params = [{transform_indices = @transform_0, window_bounds = array<i64: 64, 128>}, {transform_indices = @transform_1, window_bounds = array<i64: 64, 128>}, {transform_indices = @transform_2, window_bounds = array<i64: 5>}, {transform_indices = @transform_3, window_bounds = array<i64: 5>}, {transform_indices = @transform_4, window_bounds = array<i64: 64, 128>}]} {
    %c0 = arith.constant 0 : index
    %c0_0 = arith.constant 0 : index
    %0 = vector.load %arg1[%c0, %c0_0] : memref<64x128xi8, #tpu.memory_space<vmem>>, vector<64x128xi8>
    %1 = arith.extsi %0 : vector<64x128xi8> to vector<64x128xi32>
    %c0_1 = arith.constant 0 : index
    %c0_2 = arith.constant 0 : index
    %2 = vector.load %arg2[%c0_1, %c0_2] : memref<64x128xf32, #tpu.memory_space<vmem>>, vector<64x128xf32>
    %cst = arith.constant 0.000000e+00 : f32
    %3 = vector.broadcast %cst : f32 to vector<64x128xf32>
    %cst_3 = arith.constant 0.000000e+00 : f32
    %4 = vector.broadcast %cst_3 : f32 to vector<64x128xf32>
    %c0_i32 = arith.constant 0 : i32
    %5 = vector.broadcast %c0_i32 : i32 to vector<64x128xi32>
    %6 = arith.cmpi eq, %1, %5 : vector<64x128xi32>
    %c0_4 = arith.constant 0 : index
    %7 = memref.load %arg3[%c0_4] : memref<5xf32, #tpu.memory_space<smem>>
    %8 = vector.broadcast %7 : f32 to vector<64x128xf32>
    %9 = arith.select %6, %8, %3 : vector<64x128xi1>, vector<64x128xf32>
    %c0_5 = arith.constant 0 : index
    %10 = memref.load %arg4[%c0_5] : memref<5xf32, #tpu.memory_space<smem>>
    %11 = vector.broadcast %10 : f32 to vector<64x128xf32>
    %12 = arith.select %6, %11, %4 : vector<64x128xi1>, vector<64x128xf32>
    %c1_i32 = arith.constant 1 : i32
    %13 = vector.broadcast %c1_i32 : i32 to vector<64x128xi32>
    %14 = arith.cmpi eq, %1, %13 : vector<64x128xi32>
    %c1 = arith.constant 1 : index
    %15 = memref.load %arg3[%c1] : memref<5xf32, #tpu.memory_space<smem>>
    %16 = vector.broadcast %15 : f32 to vector<64x128xf32>
    %17 = arith.select %14, %16, %9 : vector<64x128xi1>, vector<64x128xf32>
    %c1_6 = arith.constant 1 : index
    %18 = memref.load %arg4[%c1_6] : memref<5xf32, #tpu.memory_space<smem>>
    %19 = vector.broadcast %18 : f32 to vector<64x128xf32>
    %20 = arith.select %14, %19, %12 : vector<64x128xi1>, vector<64x128xf32>
    %c2_i32 = arith.constant 2 : i32
    %21 = vector.broadcast %c2_i32 : i32 to vector<64x128xi32>
    %22 = arith.cmpi eq, %1, %21 : vector<64x128xi32>
    %c2 = arith.constant 2 : index
    %23 = memref.load %arg3[%c2] : memref<5xf32, #tpu.memory_space<smem>>
    %24 = vector.broadcast %23 : f32 to vector<64x128xf32>
    %25 = arith.select %22, %24, %17 : vector<64x128xi1>, vector<64x128xf32>
    %c2_7 = arith.constant 2 : index
    %26 = memref.load %arg4[%c2_7] : memref<5xf32, #tpu.memory_space<smem>>
    %27 = vector.broadcast %26 : f32 to vector<64x128xf32>
    %28 = arith.select %22, %27, %20 : vector<64x128xi1>, vector<64x128xf32>
    %c3_i32 = arith.constant 3 : i32
    %29 = vector.broadcast %c3_i32 : i32 to vector<64x128xi32>
    %30 = arith.cmpi eq, %1, %29 : vector<64x128xi32>
    %c3 = arith.constant 3 : index
    %31 = memref.load %arg3[%c3] : memref<5xf32, #tpu.memory_space<smem>>
    %32 = vector.broadcast %31 : f32 to vector<64x128xf32>
    %33 = arith.select %30, %32, %25 : vector<64x128xi1>, vector<64x128xf32>
    %c3_8 = arith.constant 3 : index
    %34 = memref.load %arg4[%c3_8] : memref<5xf32, #tpu.memory_space<smem>>
    %35 = vector.broadcast %34 : f32 to vector<64x128xf32>
    %36 = arith.select %30, %35, %28 : vector<64x128xi1>, vector<64x128xf32>
    %c4_i32 = arith.constant 4 : i32
    %37 = vector.broadcast %c4_i32 : i32 to vector<64x128xi32>
    %38 = arith.cmpi eq, %1, %37 : vector<64x128xi32>
    %c4 = arith.constant 4 : index
    %39 = memref.load %arg3[%c4] : memref<5xf32, #tpu.memory_space<smem>>
    %40 = vector.broadcast %39 : f32 to vector<64x128xf32>
    %41 = arith.select %38, %40, %33 : vector<64x128xi1>, vector<64x128xf32>
    %c4_9 = arith.constant 4 : index
    %42 = memref.load %arg4[%c4_9] : memref<5xf32, #tpu.memory_space<smem>>
    %43 = vector.broadcast %42 : f32 to vector<64x128xf32>
    %44 = arith.select %38, %43, %36 : vector<64x128xi1>, vector<64x128xf32>
    %45 = arith.mulf %41, %2 : vector<64x128xf32>
    %46 = arith.addf %45, %44 : vector<64x128xf32>
    %c0_10 = arith.constant 0 : index
    %c0_11 = arith.constant 0 : index
    %47 = vector.load %arg5[%c0_10, %c0_11] : memref<64x128xf32, #tpu.memory_space<vmem>>, vector<64x128xf32>
    tpu.vector_store %arg5[%c0_10, %c0_11], %46 {strides = array<i32>} : memref<64x128xf32, #tpu.memory_space<vmem>>, vector<64x128xf32>,
    return
  }
  func.func @transform_0(%arg0: i32) -> (i32, i32) {
    %c0_i32 = arith.constant 0 : i32
    %c0_i32_0 = arith.constant 0 : i32
    return %arg0, %c0_i32 : i32, i32
  }
  func.func @transform_1(%arg0: i32) -> (i32, i32) {
    %c0_i32 = arith.constant 0 : i32
    %c0_i32_0 = arith.constant 0 : i32
    return %arg0, %c0_i32 : i32, i32
  }
  func.func @transform_2(%arg0: i32) -> i32 {
    %c0_i32 = arith.constant 0 : i32
    %c0_i32_0 = arith.constant 0 : i32
    return %c0_i32 : i32
  }
  func.func @transform_3(%arg0: i32) -> i32 {
    %c0_i32 = arith.constant 0 : i32
    %c0_i32_0 = arith.constant 0 : i32
    return %c0_i32 : i32
  }
  func.func @transform_4(%arg0: i32) -> (i32, i32) {
    %c0_i32 = arith.constant 0 : i32
    %c0_i32_0 = arith.constant 0 : i32
    return %arg0, %c0_i32 : i32, i32
  }
}

</mosaic_0001>

<bundles_post_ra>
// kernel: tpu_custom_call.1
= control target key start
LH: loop header
LB: loop body
LE: loop exit
PB: predicated region body
PF: predicated region fallthrough
CT: control target
= control target key end

     0   :  { %9 = vsyncpa [#allocation3], 0  ;;  %s1447_s0 = inlined_call_operand.hbm [shape: s8[96,128], index: 0, kind: input, shape index: {}]   ;;  %s1448_s1 = inlined_call_operand.hbm [shape: f32[96,128], index: 1, kind: input, shape index: {}]   ;;  %s1449_s2 = inlined_call_operand.vmem [shape: f32[5], index: 2, kind: input, shape index: {}]   ;;  %s1450_s3 = inlined_call_operand.vmem [shape: f32[5], index: 3, kind: input, shape index: {}]   ;;  %s1451_s4 = inlined_call_operand.hbm [shape: f32[96,128], index: 4, kind: output, shape index: {}]  }
   0x1   :  { %11 = vsyncpa [#allocation3 + $0x1], 0 }
   0x2   :  { %12 = vsyncpa [#allocation7], 0 }
   0x3   :  { %14 = vsyncpa [#allocation7 + $0x1], 0 }
   0x4   :  { %15 = vsyncpa [#allocation5], 0 }
   0x5   :  { %16 = vsyncpa [#allocation10], 0 }
   0x6   :  { %17 = vsyncpa [#allocation4], 0 }
   0x7   :  { %19 = vsyncpa [#allocation4 + $0x1], 0  ;;  %s938_s15 = smov 0   ;;  %s940_s16 = smov 0  }
   0x8   :  { %s942_s17 = smov 0   ;;  %s944_s18 = smov 0  }
   0x9 LB: > { %s959_s19 = sadd.s32 4294967295, %s900_s18   ;;  %s630_s20 = sadd.s32 4294967294, %s900_s18   ;;  %s900_s18 = sphi %s944_s18, %s1474_s18   ;;  %s896_s17 = sphi %s942_s17, %s1473_s17   ;;  %s892_s16 = sphi %s940_s16, %s1472_s16   ;;  %s888_s15 = sphi %s938_s15, %s1471_s15  }
   0xa   : > { %s963_s21 = sadd.s32 1, %s900_s18   ;;  %s32_s22 = sadd.s32 1, %s896_s17 }
   0xb   : > { %s29_s23 = ssub.s32 %s900_s18, %s963_s21  ;;  %p39_p0 = scmp.ne.s32.totalorder %s896_s17, %s892_s16 }
   0xc   : > { %p30_p1 = scmp.eq.s32.totalorder %s29_s23, 0  ;;  %p40_p2 = scmp.eq.s32.totalorder %s900_s18, 0 }
   0xd   : > { %p45_p3 = scmp.ne.s32.totalorder %s892_s16, %s888_s15  ;;  %p1452_p4 = scmp.eq.s32.totalorder %s959_s19, 0 }
   0xe   : > { %s975_s24 = scalar_select %p30_p1, %s896_s17, %s32_s22  }
   0xf   : > { %p977_p5 = por %p40_p2, %p39_p0  ;;  %p983_p6 = por %p1452_p4, %p45_p3 }
  0x10   : > { %p137_p7 = scmp.eq.s32.totalorder %s959_s19, 1  ;;  %p143_p8 = scmp.eq.s32.totalorder %s630_s20, 1 }
  0x11   : > { %s1455_s25 = scalar_select %p977_p5, 1, 0 }
  0x12   : > { %s1456_s26 = scalar_select %p983_p6, 1, 0 }
  0x13   : > { %p631_p9 = scmp.ge.s32.totalorder %s900_s18, 1  ;;  %p150_p10 = scmp.lt.s32.totalorder %s900_s18, 3 }
  0x14   : > { %p990_p11 = por %p137_p7, %p39_p0  ;;  %p994_p12 = por %p143_p8, %p45_p3 }
  0x15   : > { %p998_p13 = pnand %p631_p9, %p150_p10  ;;  %s163_s6 = sshll.u32 %s1449_s2, 4  ;;  %s164_s6 = int_to_ptr.vmem [resolvable:$true] %s163_s6 }
  0x16   : > { %s1457_s27 = scalar_select %p990_p11, 1, 0 }
  0x17   : > { %s1458_s28 = scalar_select %p994_p12, 1, 0 }
  0x18   : > { %s1459_s29 = scalar_select %p998_p13, 1, 0 }
  0x19   : > { %p686_p1 = pneg %p998_p13  ;;  %s174_s9 = sshll.u32 %s1450_s3, 4  ;;  %s175_s9 = int_to_ptr.vmem [resolvable:$true] %s174_s9 }
  0x1a   : > { %s742_s11 = scalar_lea.vmem %s164_s6, 16  ;;  %p750_p9 = scmp.lt.s32.totalorder %s164_s6, %s164_s6 }
  0x1b   : > { %p1012_p0 = pnand %p686_p1, %p1452_p4  ;;  %p743_p2 = scmp.ne.s32.totalorder %s164_s6, %s742_s11 }
  0x1c   : > { %p751_p10 = scmp.lt.s32.totalorder %s742_s11, %s742_s11 }
  0x1d   : > { %p744_p3 = pneg %p1012_p0 }
  0x1e   : > { %p752_p12 = por %p751_p10, %p750_p9 }
  0x1f   : > { %p745_p7 = pnand %p744_p3, %p743_p2 }
  0x21   : > { %p746_p8 = pneg %p745_p7 }
  0x23   : > { %p753_p11 = pnand %p752_p12, %p746_p8 }
  0x25   : > { %756 = shalt.err (!%p753_p11)
}
  0x26   : > { %s902_s12 = smov [#allocation8]   ;;  %s757_s13 = scalar_lea.vmem %s175_s9, 16 }
  0x27   : > { %689 = dma.vmem_to_smem (!%p1012_p0), %s164_s6, 16, %s902_s12, [#allocation5]  }
  0x28   : > { %p758_p1 = scmp.ne.s32.totalorder %s175_s9, %s757_s13  ;;  %p765_p13 = scmp.lt.s32.totalorder %s175_s9, %s175_s9 }
  0x29   : > { %p766_p5 = scmp.lt.s32.totalorder %s757_s13, %s757_s13 }
  0x2a   : > { %p760_p4 = pnand %p758_p1, %p744_p3 }
  0x2b   : > { %p767_p2 = por %p766_p5, %p765_p13 }
  0x2c   : > { %p761_p6 = pneg %p760_p4 }
  0x2e   : > { %p768_p7 = pnand %p767_p2, %p761_p6 }
  0x30   : > { %771 = shalt.err (!%p768_p7)
}
  0x31   : > { %s903_s14 = smov [#allocation9]   ;;  %p634_p11 = scmp.ge.s32.totalorder %s900_s18, 2 }
  0x32   : > { %692 = dma.vmem_to_smem (!%p1012_p0), %s175_s9, 16, %s903_s14, [#allocation10]  }
  0x33   : > { %181 = sbr.rel (%p634_p11) target bundleno = 122 (0x7a), region = 24  ;;  %p1461_p12 = scmp.ne.s32.totalorder (!%p634_p11), %s1455_s25, 0 }
  0x38   : > { %184 = sbr.rel (!%p1461_p12) target bundleno = 88 (0x58), region = 28  ;;  %s185_s20 = sand.u32 (%p1461_p12), 1, %s896_s17  }
  0x39   : > { %s636_s22 = sshll.u32 (%p1461_p12), %s900_s18, 1  ;;  %s635_s23 = sshll.u32 (%p1461_p12), %s185_s20, 4 }
  0x3a   : > { %s191_s30 = ssub.s32 (%p1461_p12), 3, %s636_s22  ;;  %s1032_s7 = scalar_lea.sflag (%p1461_p12), [#allocation3], %s185_s20 }
  0x3b   : > { %p192_p4 = scmp.lt.s32.totalorder (%p1461_p12), %s191_s30, 2  ;;  %s189_s8 = scalar_lea.vmem (%p1461_p12), [#allocation2], %s635_s23 }
  0x3d   : > { %s1476_s30 = smov (!%p192_p4, %s191_s30), 2 }
  0x3e   : > { %s1029_s5 = sshll.u32 %s1476_s30, 7 }
  0x3f   : > { %s196_s6 = ssub.s32 256, %s1029_s5 }
  0x40   : > { %197 = vsyncadd %s1032_s7, %s196_s6  ;;  %p638_p5 = scmp.ne.s32.totalorder %s1029_s5, 0  ;;  %s672_s9 = sshll.u32 %s900_s18, 8 }
  0x41   : > { %s1040_s12 = scalar_lea.hbm %s1447_s0, %s672_s9  ;;  %s202_s13 = sshll.u32 %s189_s8, 4  ;;  %s1042_s13 = int_to_ptr.vmem [resolvable:$true] %s202_s13 }
  0x42   : > { %s772_s14 = scalar_lea.hbm %s1040_s12, %s1029_s5  ;;  %s776_s23 = scalar_lea.hbm %s1447_s0, 384 }
  0x43   : > { %p773_p6 = scmp.ne.s32.totalorder %s1040_s12, %s772_s14  ;;  %p777_p3 = scmp.lt.s32.totalorder %s1040_s12, %s1447_s0 }
  0x44   : > { %p778_p8 = scmp.lt.s32.totalorder %s776_s23, %s772_s14 }
  0x45   : > { %p774_p13 = pnand %p773_p6, %p638_p5 }
  0x46   : > { %p779_p9 = por %p778_p8, %p777_p3 }
  0x47   : > { %p775_p0 = pneg %p774_p13 }
  0x49   : > { %p780_p10 = pnand %p779_p9, %p775_p0 }
  0x4b   : > { %783 = shalt.err (!%p780_p10)
}
  0x4c   : > { %s784_s8 = scalar_lea.vmem %s1042_s13, %s1029_s5  ;;  %s904_s9 = smov [#allocation2]  }
  0x4d   : > { %p785_p1 = scmp.ne.s32.totalorder %s1042_s13, %s784_s8  ;;  %s788_s10 = sshll.u32 %s904_s9, 4  ;;  %s789_s10 = int_to_ptr.vmem [resolvable:$false] %s788_s10 }
  0x4e   : > { %s790_s11 = scalar_lea.vmem %s789_s10, 512  ;;  %p791_p12 = scmp.lt.s32.totalorder %s1042_s13, %s789_s10 }
  0x4f   : > { %p786_p2 = pnand %p785_p1, %p638_p5  ;;  %p792_p4 = scmp.lt.s32.totalorder %s790_s11, %s784_s8 }
  0x51   : > { %p787_p7 = pneg %p786_p2  ;;  %p793_p6 = por %p792_p4, %p791_p12 }
  0x53   : > { %p794_p13 = pnand %p793_p6, %p787_p7 }
  0x55   : > { %797 = shalt.err (!%p794_p13)
}
  0x56   : > { %s905_s14 = smov 128   ;;  %s906_s20 = smov 8  }
  0x57   : > { %208 = dma.hbm_to_vmem [thread:$0]  (%p638_p5), %s1040_s12, %s1029_s5, %s1042_s13, %s1032_s7, %s905_s14, %s905_s14, %s906_s20  }
  0x58 PF: > { %p1462_p0 = scmp.ne.s32.totalorder %s1455_s25, 0 }
  0x59   : > { %s212_s22 = sand.u32 (%p1462_p0), 1, %s896_s17   ;;  %s643_s23 = sshll.u32 (%p1462_p0), %s900_s18, 3 }
  0x5a   : > { %211 = sbr.rel (!%p1462_p0) target bundleno = 122 (0x7a), region = 32  ;;  %s642_s30 = sshll.u32 (%p1462_p0), %s212_s22, 6 }
  0x5b   : > { %s218_s6 = ssub.s32 (%p1462_p0), 12, %s643_s23  ;;  %s1075_s10 = scalar_lea.sflag (%p1462_p0), [#allocation7], %s212_s22 }
  0x5c   : > { %p219_p3 = scmp.lt.s32.totalorder (%p1462_p0), %s218_s6, 8  ;;  %s216_s5 = scalar_lea.vmem (%p1462_p0), [#allocation6], %s642_s30 }
  0x5f   : > { %s1478_s6 = smov (!%p219_p3, %s218_s6), 8 }
  0x60   : > { %s1072_s8 = sshll.u32 %s1478_s6, 7 }
  0x61   : > { %s223_s9 = ssub.s32 1024, %s1072_s8 }
  0x62   : > { %224 = vsyncadd %s1075_s10, %s223_s9  ;;  %p645_p5 = scmp.ne.s32.totalorder %s1072_s8, 0  ;;  %s673_s25 = sshll.u32 %s900_s18, 10 }
  0x63   : > { %s1083_s13 = scalar_lea.hbm %s1448_s1, %s673_s25  ;;  %s229_s11 = sshll.u32 %s216_s5, 4  ;;  %s1085_s11 = int_to_ptr.vmem [resolvable:$true] %s229_s11 }
  0x64   : > { %s798_s14 = scalar_lea.hbm %s1083_s13, %s1072_s8  ;;  %s802_s23 = scalar_lea.hbm %s1448_s1, 1536 }
  0x65   : > { %p799_p8 = scmp.ne.s32.totalorder %s1083_s13, %s798_s14  ;;  %p803_p1 = scmp.lt.s32.totalorder %s1083_s13, %s1448_s1 }
  0x66   : > { %p804_p2 = scmp.lt.s32.totalorder %s802_s23, %s798_s14 }
  0x67   : > { %p800_p9 = pnand %p799_p8, %p645_p5 }
  0x68   : > { %p805_p7 = por %p804_p2, %p803_p1 }
  0x69   : > { %p801_p10 = pneg %p800_p9 }
  0x6b   : > { %p806_p12 = pnand %p805_p7, %p801_p10 }
  0x6d   : > { %809 = shalt.err (!%p806_p12)
}
  0x6e   : > { %s810_s9 = scalar_lea.vmem %s1085_s11, %s1072_s8  ;;  %s907_s5 = smov [#allocation6]  }
  0x6f   : > { %p811_p4 = scmp.ne.s32.totalorder %s1085_s11, %s810_s9  ;;  %s814_s25 = sshll.u32 %s907_s5, 4  ;;  %s815_s25 = int_to_ptr.vmem [resolvable:$false] %s814_s25 }
  0x70   : > { %s816_s7 = scalar_lea.vmem %s815_s25, 2048  ;;  %p817_p0 = scmp.lt.s32.totalorder %s1085_s11, %s815_s25 }
  0x71   : > { %p812_p6 = pnand %p811_p4, %p645_p5  ;;  %p818_p3 = scmp.lt.s32.totalorder %s816_s7, %s810_s9 }
  0x73   : > { %p813_p13 = pneg %p812_p6  ;;  %p819_p8 = por %p818_p3, %p817_p0 }
  0x75   : > { %p820_p9 = pnand %p819_p8, %p813_p13 }
  0x77   : > { %823 = shalt.err (!%p820_p9)
}
  0x78   : > { %s908_s12 = smov 128   ;;  %s909_s14 = smov 8  }
  0x79   : > { %235 = dma.hbm_to_vmem [thread:$0]  (%p645_p5), %s1083_s13, %s1072_s8, %s1085_s11, %s1075_s10, %s908_s12, %s908_s12, %s909_s14  }
  0x7a PF: > { %p1463_p10 = scmp.ne.s32.totalorder %s1459_s29, 0 }
  0x7b   : > { %s1114_s20 = sand.u32 (!%p1463_p10), 1, %s892_s16   ;;  %p1464_p1 = scmp.ne.s32.totalorder (!%p1463_p10), %s1456_s26, 0 }
  0x7c   : > { %241 = sbr.rel (%p1463_p10) target bundleno = 214 (0xd6), region = 36  ;;  %s650_s22 = sshll.u32 (!%p1463_p10), %s1114_s20, 4 }
  0x7d   : > { %s244_s23 = scalar_lea.sflag (!%p1463_p10), [#allocation3], %s1114_s20  ;;  %s247_s30 = scalar_lea.vmem (!%p1463_p10), [#allocation2], %s650_s22 }
  0x81   : > { %867 = dma.done.wait (%p1464_p1), %s244_s23, 256  }
  0x82   : > { %869 = vsyncadd (%p1464_p1), %s244_s23, 4294967040  ;;  %s651_s29 = sshll.u32 %s1114_s20, 6  ;;  %s253_s8 = scalar_lea.sflag [#allocation7], %s1114_s20 }
  0x83   : > { %s1126_s10 = scalar_lea.vmem [#allocation6], %s651_s29 }
  0x84   : > { %871 = dma.done.wait (%p1464_p1), %s253_s8, 1024  }
  0x85   : > { %873 = vsyncadd (%p1464_p1), %s253_s8, 4294966272  ;;  %p1465_p5 = scmp.eq.s32.totalorder %s959_s19, 0 }
  0x87   : > { %875 = dma.done.wait (%p1465_p5), [#allocation5], 16   ;;  %p1466_p2 = pmov %p1465_p5 }
  0x89   : > { %877 = vsyncadd (%p1466_p2), [#allocation5], 4294967280  ;;  %p1467_p7 = pmov %p1466_p2 }
  0x8a   : > { %p1468_p12 = pmov %p1466_p2 }
  0x8b   : > { %879 = dma.done.wait (%p1467_p7), [#allocation10], 16  }
  0x8c   : > { %881 = vsyncadd (%p1468_p12), [#allocation10], 4294967280 }
  0x8d   : > { %269 = sfence }
  0x8e   : > { %v310_v0 = vld [vmem:[%s247_s30] sm:$0xff]  ;;  %s336_s13 = sld [smem:[#allocation8]]  ;;  %v311_v5 = vld [vmem:[%s247_s30 + $0x8] sm:$0xff]  ;;  %s1302_s22 = scalar_lea.vmem [#allocation11], %s651_s29 }
  0x8f   : > { %v1140_v1 = vunpack.c.0.s8 %v310_v0  ;;  %s1142_s11 = sld [smem:[#allocation9]]  ;;  %v1144_v2 = vunpack.c.1.s8 %v310_v0  ;;  %v1146_v3 = vunpack.c.2.s8 %v310_v0  ;;  %v1148_v4 = vunpack.c.3.s8 %v310_v0  ;;  %v320_v35 = vld [vmem:[%s1126_s10] sm:$0xff]  ;;  %v321_v38 = vld [vmem:[%s1126_s10 + $0x8] sm:$0xff]  ;;  %v322_v44 = vld [vmem:[%s1126_s10 + $0x10] sm:$0xff]  ;;  %s493_s23 = scalar_lea.sflag [#allocation4], %s1114_s20 }
  0x90   : > { %s1150_s26 = sld [smem:[#allocation8 + $0x1]]  ;;  %v1152_v6 = vunpack.c.0.s8 %v311_v5  ;;  %v1154_v7 = vunpack.c.1.s8 %v311_v5  ;;  %v1156_v8 = vunpack.c.2.s8 %v311_v5  ;;  %v1158_v9 = vunpack.c.3.s8 %v311_v5  ;;  %v323_v63 = vld [vmem:[%s1126_s10 + $0x18] sm:$0xff]  ;;  %p1469_p4 = scmp.ne.s32.totalorder %s1457_s27, 0 }
  0x91   : > { %vm328_vm0 = vcmp.eq.s32.totalorder %v1140_v1, 0  ;;  %vm356_vm1 = vcmp.eq.s32.totalorder %v1140_v1, 1  ;;  %s656_s6 = sld [smem:[#allocation9 + $0x1]]  ;;  %vm384_vm2 = vcmp.eq.s32.totalorder %v1140_v1, 2  ;;  %vm412_vm3 = vcmp.eq.s32.totalorder %v1140_v1, 3  ;;  %s664_s30 = sshll.u32 (%p1469_p4), %s959_s19, 3 }
  0x92   : > { %s1164_s9 = sld [smem:[#allocation8 + $0x2]]  ;;  %vm440_vm4 = vcmp.eq.s32.totalorder %v1140_v1, 4  ;;  %vm329_vm5 = vcmp.eq.s32.totalorder %v1144_v2, 0  ;;  %vm357_vm6 = vcmp.eq.s32.totalorder %v1144_v2, 1  ;;  %vm385_vm7 = vcmp.eq.s32.totalorder %v1144_v2, 2  ;;  %s501_s29 = ssub.s32 (%p1469_p4), 12, %s664_s30 }
  0x93   : > { %s658_s5 = sld [smem:[#allocation9 + $0x2]]  ;;  %vm413_vm8 = vcmp.eq.s32.totalorder %v1144_v2, 3  ;;  %vm441_vm9 = vcmp.eq.s32.totalorder %v1144_v2, 4  ;;  %vm330_vm10 = vcmp.eq.s32.totalorder %v1146_v3, 0  ;;  %vm358_vm11 = vcmp.eq.s32.totalorder %v1146_v3, 1  ;;  %p502_p6 = scmp.lt.s32.totalorder (%p1469_p4), %s501_s29, 8 }
  0x94   : > { %v1174_v10 = vstv %s336_s13  ;;  %s659_s25 = sld [smem:[#allocation8 + $0x3]]  ;;  %vm386_vm12 = vcmp.eq.s32.totalorder %v1146_v3, 2  ;;  %vm414_vm13 = vcmp.eq.s32.totalorder %v1146_v3, 3  ;;  %vm442_vm14 = vcmp.eq.s32.totalorder %v1146_v3, 4 }
  0x95   : > { %v338_v11 = vsel %vm328_vm0, %v1174_v10, 0.0  ;;  %v1183_v12 = vstv %s1142_s11  ;;  %s660_s7 = sld [smem:[#allocation9 + $0x3]]  ;;  %v339_v13 = vsel %vm329_vm5, %v1174_v10, 0.0  ;;  %v340_v14 = vsel %vm330_vm10, %v1174_v10, 0.0 }
  0x96   : > { %v348_v15 = vsel %vm328_vm0, %v1183_v12, 0.0  ;;  %v1195_v16 = vstv %s1150_s26  ;;  %s661_s12 = sld [smem:[#allocation8 + $0x4]]  ;;  %v349_v17 = vsel %vm329_vm5, %v1183_v12, 0.0  ;;  %v350_v18 = vsel %vm330_vm10, %v1183_v12, 0.0 }
  0x97   : > { %v366_v19 = vsel %vm356_vm1, %v1195_v16, %v338_v11  ;;  %v1206_v20 = vstv %s656_s6  ;;  %s662_s14 = sld [smem:[#allocation9 + $0x4]]  ;;  %v367_v21 = vsel %vm357_vm6, %v1195_v16, %v339_v13  ;;  %v368_v22 = vsel %vm358_vm11, %v1195_v16, %v340_v14 }
  0x98   : > { %v376_v23 = vsel %vm356_vm1, %v1206_v20, %v348_v15  ;;  %v1218_v24 = vstv %s1164_s9  ;;  %v377_v25 = vsel %vm357_vm6, %v1206_v20, %v349_v17  ;;  %v378_v26 = vsel %vm358_vm11, %v1206_v20, %v350_v18  ;;  %v324_v18 = vld [vmem:[%s1126_s10 + $0x20] sm:$0xff] }
  0x99   : > { %v394_v27 = vsel %vm384_vm2, %v1218_v24, %v366_v19  ;;  %v1229_v28 = vstv %s658_s5  ;;  %v395_v29 = vsel %vm385_vm7, %v1218_v24, %v367_v21  ;;  %v396_v30 = vsel %vm386_vm12, %v1218_v24, %v368_v22 }
  0x9a   : > { %v404_v31 = vsel %vm384_vm2, %v1229_v28, %v376_v23  ;;  %v1240_v32 = vstv %s659_s25  ;;  %v405_v33 = vsel %vm385_vm7, %v1229_v28, %v377_v25  ;;  %v406_v34 = vsel %vm386_vm12, %v1229_v28, %v378_v26 }
  0x9b   : > { %v422_v36 = vsel %vm412_vm3, %v1240_v32, %v394_v27  ;;  %v1252_v37 = vstv %s660_s7  ;;  %v423_v39 = vsel %vm413_vm8, %v1240_v32, %v395_v29  ;;  %v424_v40 = vsel %vm414_vm13, %v1240_v32, %v396_v30 }
  0x9c   : > { %v432_v41 = vsel %vm412_vm3, %v1252_v37, %v404_v31  ;;  %v1264_v42 = vstv %s661_s12  ;;  %v433_v43 = vsel %vm413_vm8, %v1252_v37, %v405_v33  ;;  %v434_v45 = vsel %vm414_vm13, %v1252_v37, %v406_v34 }
  0x9d   : > { %v450_v46 = vsel %vm440_vm4, %v1264_v42, %v422_v36  ;;  %v1276_v47 = vstv %s662_s14  ;;  %v451_v48 = vsel %vm441_vm9, %v1264_v42, %v423_v39  ;;  %v452_v49 = vsel %vm442_vm14, %v1264_v42, %v424_v40 }
  0x9e   : > { %v460_v50 = vsel %vm440_vm4, %v1276_v47, %v432_v41  ;;  %v468_v51 = vmul.f32 %v450_v46, %v320_v35  ;;  %v461_v52 = vsel %vm441_vm9, %v1276_v47, %v433_v43  ;;  %v469_v53 = vmul.f32 %v451_v48, %v321_v38  ;;  %v325_v35 = vld [vmem:[%s1126_s10 + $0x28] sm:$0xff] }
  0x9f   : > { %v462_v54 = vsel %vm442_vm14, %v1276_v47, %v434_v45  ;;  %v470_v55 = vmul.f32 %v452_v49, %v322_v44  ;;  %vm331_vm15 = vcmp.eq.s32.totalorder %v1148_v4, 0  ;;  %vm359_vm0 = vcmp.eq.s32.totalorder %v1148_v4, 1  ;;  %v326_v49 = vld [vmem:[%s1126_s10 + $0x30] sm:$0xff] }
  0xa0   : > { %v476_v56 = vadd.f32 %v468_v51, %v460_v50  ;;  %v477_v57 = vadd.f32 %v469_v53, %v461_v52  ;;  %v341_v58 = vsel %vm331_vm15, %v1174_v10, 0.0  ;;  %v351_v59 = vsel %vm331_vm15, %v1183_v12, 0.0 }
  0xa1   : > { %v478_v60 = vadd.f32 %v470_v55, %v462_v54  ;;  %v369_v61 = vsel %vm359_vm0, %v1195_v16, %v341_v58  ;;  %v379_v62 = vsel %vm359_vm0, %v1206_v20, %v351_v59  ;;  %vm387_vm1 = vcmp.eq.s32.totalorder %v1148_v4, 2 }
  0xa2   : > { %484 = vst [vmem:[%s1302_s22] sm:$0xff] %v476_v56  ;;  %485 = vst [vmem:[%s1302_s22 + $0x8] sm:$0xff] %v477_v57  ;;  %v397_v0 = vsel %vm387_vm1, %v1218_v24, %v369_v61  ;;  %v407_v1 = vsel %vm387_vm1, %v1229_v28, %v379_v62  ;;  %vm415_vm2 = vcmp.eq.s32.totalorder %v1148_v4, 3  ;;  %vm443_vm3 = vcmp.eq.s32.totalorder %v1148_v4, 4 }
  0xa3   : > { %486 = vst [vmem:[%s1302_s22 + $0x10] sm:$0xff] %v478_v60  ;;  %v425_v2 = vsel %vm415_vm2, %v1240_v32, %v397_v0  ;;  %v435_v3 = vsel %vm415_vm2, %v1252_v37, %v407_v1  ;;  %vm332_vm4 = vcmp.eq.s32.totalorder %v1152_v6, 0  ;;  %vm360_vm5 = vcmp.eq.s32.totalorder %v1152_v6, 1 }
  0xa4   : > { %v453_v5 = vsel %vm443_vm3, %v1264_v42, %v425_v2  ;;  %v463_v11 = vsel %vm443_vm3, %v1276_v47, %v435_v3  ;;  %v342_v13 = vsel %vm332_vm4, %v1174_v10, 0.0  ;;  %v352_v14 = vsel %vm332_vm4, %v1183_v12, 0.0 }
  0xa5   : > { %v471_v15 = vmul.f32 %v453_v5, %v323_v63  ;;  %v370_v4 = vsel %vm360_vm5, %v1195_v16, %v342_v13  ;;  %v380_v17 = vsel %vm360_vm5, %v1206_v20, %v352_v14  ;;  %vm388_vm6 = vcmp.eq.s32.totalorder %v1152_v6, 2 }
  0xa6   : > { %v398_v19 = vsel %vm388_vm6, %v1218_v24, %v370_v4  ;;  %v408_v21 = vsel %vm388_vm6, %v1229_v28, %v380_v17  ;;  %vm416_vm7 = vcmp.eq.s32.totalorder %v1152_v6, 3  ;;  %vm444_vm8 = vcmp.eq.s32.totalorder %v1152_v6, 4 }
  0xa7   : > { %v479_v22 = vadd.f32 %v471_v15, %v463_v11  ;;  %v426_v23 = vsel %vm416_vm7, %v1240_v32, %v398_v19  ;;  %v436_v25 = vsel %vm416_vm7, %v1252_v37, %v408_v21  ;;  %vm333_vm9 = vcmp.eq.s32.totalorder %v1154_v7, 0 }
  0xa8   : > { %v454_v26 = vsel %vm444_vm8, %v1264_v42, %v426_v23  ;;  %v464_v27 = vsel %vm444_vm8, %v1276_v47, %v436_v25  ;;  %v343_v29 = vsel %vm333_vm9, %v1174_v10, 0.0  ;;  %v353_v30 = vsel %vm333_vm9, %v1183_v12, 0.0 }
  0xa9   : > { %487 = vst [vmem:[%s1302_s22 + $0x18] sm:$0xff] %v479_v22  ;;  %v472_v31 = vmul.f32 %v454_v26, %v324_v18  ;;  %vm361_vm10 = vcmp.eq.s32.totalorder %v1154_v7, 1  ;;  %vm389_vm11 = vcmp.eq.s32.totalorder %v1154_v7, 2  ;;  %vm417_vm12 = vcmp.eq.s32.totalorder %v1154_v7, 3 }
  0xaa   : > { %v371_v6 = vsel %vm361_vm10, %v1195_v16, %v343_v29  ;;  %v381_v33 = vsel %vm361_vm10, %v1206_v20, %v353_v30  ;;  %vm445_vm13 = vcmp.eq.s32.totalorder %v1154_v7, 4  ;;  %vm334_vm14 = vcmp.eq.s32.totalorder %v1156_v8, 0 }
  0xab   : > { %v480_v34 = vadd.f32 %v472_v31, %v464_v27  ;;  %v399_v36 = vsel %vm389_vm11, %v1218_v24, %v371_v6  ;;  %v409_v38 = vsel %vm389_vm11, %v1229_v28, %v381_v33  ;;  %v344_v39 = vsel %vm334_vm14, %v1174_v10, 0.0 }
  0xac   : > { %v427_v40 = vsel %vm417_vm12, %v1240_v32, %v399_v36  ;;  %v437_v41 = vsel %vm417_vm12, %v1252_v37, %v409_v38  ;;  %v354_v43 = vsel %vm334_vm14, %v1183_v12, 0.0  ;;  %vm362_vm15 = vcmp.eq.s32.totalorder %v1156_v8, 1 }
  0xad   : > { %488 = vst [vmem:[%s1302_s22 + $0x20] sm:$0xff] %v480_v34  ;;  %v455_v7 = vsel %vm445_vm13, %v1264_v42, %v427_v40  ;;  %v465_v44 = vsel %vm445_vm13, %v1276_v47, %v437_v41  ;;  %v372_v45 = vsel %vm362_vm15, %v1195_v16, %v344_v39  ;;  %v382_v46 = vsel %vm362_vm15, %v1206_v20, %v354_v43 }
  0xae   : > { %v473_v48 = vmul.f32 %v455_v7, %v325_v35  ;;  %vm390_vm0 = vcmp.eq.s32.totalorder %v1156_v8, 2  ;;  %vm418_vm1 = vcmp.eq.s32.totalorder %v1156_v8, 3  ;;  %vm446_vm2 = vcmp.eq.s32.totalorder %v1156_v8, 4 }
  0xaf   : > { %v400_v50 = vsel %vm390_vm0, %v1218_v24, %v372_v45  ;;  %v410_v51 = vsel %vm390_vm0, %v1229_v28, %v382_v46  ;;  %vm335_vm3 = vcmp.eq.s32.totalorder %v1158_v9, 0  ;;  %vm363_vm4 = vcmp.eq.s32.totalorder %v1158_v9, 1 }
  0xb0   : > { %v481_v52 = vadd.f32 %v473_v48, %v465_v44  ;;  %v428_v53 = vsel %vm418_vm1, %v1240_v32, %v400_v50  ;;  %v438_v54 = vsel %vm418_vm1, %v1252_v37, %v410_v51  ;;  %v345_v55 = vsel %vm335_vm3, %v1174_v10, 0.0  ;;  %v327_v10 = vld [vmem:[%s1126_s10 + $0x38] sm:$0xff] }
  0xb1   : > { %v456_v56 = vsel %vm446_vm2, %v1264_v42, %v428_v53  ;;  %v466_v8 = vsel %vm446_vm2, %v1276_v47, %v438_v54  ;;  %v355_v57 = vsel %vm335_vm3, %v1183_v12, 0.0  ;;  %v373_v58 = vsel %vm363_vm4, %v1195_v16, %v345_v55 }
  0xb2   : > { %489 = vst [vmem:[%s1302_s22 + $0x28] sm:$0xff] %v481_v52  ;;  %v474_v59 = vmul.f32 %v456_v56, %v326_v49  ;;  %v383_v60 = vsel %vm363_vm4, %v1206_v20, %v355_v57  ;;  %vm391_vm5 = vcmp.eq.s32.totalorder %v1158_v9, 2  ;;  %vm419_vm6 = vcmp.eq.s32.totalorder %v1158_v9, 3 }
  0xb3   : > { %v401_v61 = vsel %vm391_vm5, %v1218_v24, %v373_v58  ;;  %v411_v62 = vsel %vm391_vm5, %v1229_v28, %v383_v60  ;;  %vm447_vm7 = vcmp.eq.s32.totalorder %v1158_v9, 4 }
  0xb4   : > { %v482_v12 = vadd.f32 %v474_v59, %v466_v8  ;;  %v429_v16 = vsel %vm419_vm6, %v1240_v32, %v401_v61  ;;  %v439_v63 = vsel %vm419_vm6, %v1252_v37, %v411_v62 }
  0xb5   : > { %v457_v0 = vsel %vm447_vm7, %v1264_v42, %v429_v16  ;;  %v467_v20 = vsel %vm447_vm7, %v1276_v47, %v439_v63 }
  0xb6   : > { %490 = vst [vmem:[%s1302_s22 + $0x30] sm:$0xff] %v482_v12  ;;  %v475_v1 = vmul.f32 %v457_v0, %v327_v10  ;;  %499 = sbr.rel (!%p1469_p4) target bundleno = 214 (0xd6), region = 56 }
  0xb8   : > { %v483_v2 = vadd.f32 %v475_v1, %v467_v20 }
  0xba   : > { %491 = vst [vmem:[%s1302_s22 + $0x38] sm:$0xff] %v483_v2 }
  0xbb   : > { %s1480_s29 = smov (!%p502_p6, %s501_s29), 8 }
  0xbc   : > { %s1389_s8 = sshll.u32 %s1480_s29, 7 }
  0xbd   : > { %s506_s10 = ssub.s32 1024, %s1389_s8 }
  0xbe   : > { %507 = vsyncadd %s493_s23, %s506_s10  ;;  %p666_p13 = scmp.ne.s32.totalorder %s1389_s8, 0  ;;  %s674_s27 = sshll.u32 %s959_s19, 10 }
  0xbf   : > { %s1399_s26 = scalar_lea.hbm %s1451_s4, %s674_s27  ;;  %s512_s6 = sshll.u32 %s1302_s22, 4  ;;  %s1402_s6 = int_to_ptr.vmem [resolvable:$true] %s512_s6 }
  0xc0   : > { %s824_s9 = scalar_lea.vmem %s1402_s6, %s1389_s8  ;;  %s910_s5 = smov [#allocation11]  }
  0xc1   : > { %p825_p0 = scmp.ne.s32.totalorder %s1402_s6, %s824_s9  ;;  %s828_s25 = sshll.u32 %s910_s5, 4  ;;  %s829_s25 = int_to_ptr.vmem [resolvable:$false] %s828_s25 }
  0xc2   : > { %s830_s19 = scalar_lea.vmem %s829_s25, 2048  ;;  %p831_p9 = scmp.lt.s32.totalorder %s1402_s6, %s829_s25 }
  0xc3   : > { %p826_p3 = pnand %p825_p0, %p666_p13  ;;  %p832_p10 = scmp.lt.s32.totalorder %s830_s19, %s824_s9 }
  0xc5   : > { %p827_p8 = pneg %p826_p3  ;;  %p833_p1 = por %p832_p10, %p831_p9 }
  0xc7   : > { %p834_p5 = pnand %p833_p1, %p827_p8 }
  0xc9   : > { %837 = shalt.err (!%p834_p5)
}
  0xca   : > { %s838_s7 = scalar_lea.hbm %s1399_s26, %s1389_s8  ;;  %s842_s22 = scalar_lea.hbm %s1451_s4, 1536 }
  0xcb   : > { %p839_p2 = scmp.ne.s32.totalorder %s1399_s26, %s838_s7  ;;  %p843_p4 = scmp.lt.s32.totalorder %s1399_s26, %s1451_s4 }
  0xcc   : > { %p844_p6 = scmp.lt.s32.totalorder %s842_s22, %s838_s7 }
  0xcd   : > { %p840_p7 = pnand %p839_p2, %p666_p13 }
  0xce   : > { %p845_p0 = por %p844_p6, %p843_p4 }
  0xcf   : > { %p841_p12 = pneg %p840_p7 }
  0xd1   : > { %p846_p3 = pnand %p845_p0, %p841_p12 }
  0xd3   : > { %849 = shalt.err (!%p846_p3)
}
  0xd4   : > { %s911_s10 = smov 128   ;;  %s912_s27 = smov 8  }
  0xd5   : > { %518 = dma.vmem_to_hbm [thread:$0]  (%p666_p13), %s1402_s6, %s1389_s8, %s1399_s26, %s493_s23, %s911_s10, %s911_s10, %s912_s27  }
  0xd6 PF: > { %s527_s13 = sand.u32 1, %s888_s15   ;;  %p1470_p8 = scmp.ne.s32.totalorder %s1458_s28, 0 }
  0xd7   : > { %s528_s11 = scalar_lea.sflag [#allocation4], %s527_s13 }
  0xd8   : > { %p694_p9 = pnand %p634_p11, %p1470_p8 }
  0xda   : > { %p695_p10 = pneg %p694_p9 }
  0xdc   : > { %883 = dma.done.wait (%p695_p10), %s528_s11, 1024  }
  0xdd   : > { %885 = vsyncadd (%p695_p10), %s528_s11, 4294966272  ;;  %p22_p1 = scmp.ge.s32.totalorder %s963_s21, 4   ;;  %s1471_s15 = smov %s892_s16 }
  0xde   : > { %s1472_s16 = smov %s896_s17  ;;  %s1473_s17 = smov %s975_s24 }
  0xdf   : > { %s1474_s18 = smov %s963_s21  ;;  %24 = sbr.rel (!%p22_p1) target bundleno = 9 (0x9), region = 103 }
  0xe4   :  { %533 = vsyncpa [#allocation3], 1 }
  0xe5   :  { %535 = vsyncpa [#allocation3 + $0x1], 1 }
  0xe6   :  { %536 = vsyncpa [#allocation7], 1 }
  0xe7   :  { %538 = vsyncpa [#allocation7 + $0x1], 1 }
  0xe8   :  { %539 = vsyncpa [#allocation4], 1 }
  0xe9   :  { %541 = vsyncpa [#allocation4 + $0x1], 1 }
  0xea   :  { %542 = vsyncpa [#allocation5], 1 }
  0xeb   :  { %544 = vsyncpa [#allocation5 + $0x1], 1 }
  0xec   :  { %545 = vsyncpa [#allocation10], 1 }

</bundles_post_ra>
